<compile_context>
chip_gen: v7x
topology: tpu7x:2x2x1
jax: 0.10.0
libtpu: 0.0.40
codegen_flags: <defaults>
</compile_context>

<pallas_src>
import jax
import jax.numpy as jnp
from jax.experimental import pallas as pl
from jax.experimental.pallas import tpu as pltpu

KSIZE = 7        # Conv1d kernel_size
PAD = 3          # Conv1d padding
HID_CH = 32      # channels of the first conv output
CLS_PAD = 128    # lane-dense padded class width of the output slab
NEG_INF = -1e30  # padded-class bias (safe while logits stay f32)


def _pssm_kernel(x_ref, w1_ref, b1_ref, w2_ref, b2_ref, out_ref):
    """BB batch elements per grid step, fully fused across the BB*L rows.

    x_ref  : (BB, L, H)        unpadded input, channels-last (compute dtype)
    w1_ref : (H, 7*32)         conv1 weights, taps stacked on the out axis
    b1_ref : (1, 32)           conv1 bias (f32)
    w2_ref : (7*32, 128)       conv2 weights, im2col layout, classes padded
    b2_ref : (1, 128)          conv2 bias, padded entries = -1e30 (f32)
    out_ref: (BB, L, 128)      softmax probabilities (padded classes == 0)
    """
    BB, L, H = x_ref.shape
    N = BB * L

    # Per-row position inside its own sequence (0..L-1), replicated over the
    # 32 hidden-channel lanes.  Used to zero halo taps that fall outside a
    # sequence; this replaces the zero-padded (L+6, H) copy of the input and
    # also stops taps bleeding between packed batch elements.
    local = jax.lax.broadcasted_iota(jnp.int32, (BB, L, HID_CH), 1)
    local = local.reshape(N, HID_CH)

    def shift_tap(tap, dt):
        # tap[i + dt] with zeros where i + dt falls outside [0, L) of the
        # row's own sequence.  pltpu.roll keeps the shift on the otherwise
        # idle XLU; the select is a cheap VPU op.  (All rolls are on f32.)
        rolled = pltpu.roll(tap, shift=(-dt) % N, axis=0)
        valid = (local < L - dt) if dt > 0 else (local >= -dt)
        return jnp.where(valid, rolled, 0.0)

    # ---- Conv1d(H -> 32, k=7, p=3): ONE tap-stacked matmul on unpadded rows,
    # halo folded in with 6 rolled + masked adds.
    xf = x_ref[...].reshape(N, H)
    y = jnp.dot(xf, w1_ref[...], preferred_element_type=jnp.float32)  # (N, 224)
    acc1 = y[:, PAD * HID_CH:(PAD + 1) * HID_CH]                      # dt == 0
    for t in range(KSIZE):
        dt = t - PAD
        if dt == 0:
            continue
        acc1 = acc1 + shift_tap(y[:, t * HID_CH:(t + 1) * HID_CH], dt)
    h = jnp.maximum(acc1 + b1_ref[...], 0.0)            # (N, 32) f32, ReLU
    # Dropout is identity at inference time.

    # ---- Conv1d(32 -> C, k=7, p=3): im2col windows built from rolls of h,
    # consumed by ONE (N, 224) @ (224, 128) matmul (keep the K=224 form).
    cols = [h if t == PAD else shift_tap(h, t - PAD) for t in range(KSIZE)]
    hwin = jnp.concatenate(cols, axis=-1).astype(w2_ref.dtype)        # (N, 224)
    logits = jnp.dot(hwin, w2_ref[...], preferred_element_type=jnp.float32)
    logits = logits + b2_ref[...]                       # (N, 128) f32

    # ---- softmax over the (padded) class axis; padded lanes carry -1e30 so
    # their exp underflows to exactly 0.
    m = jnp.max(logits, axis=-1, keepdims=True)
    e = jnp.exp(logits - m)
    denom = jnp.sum(e, axis=-1, keepdims=True)
    probs = e * pl.reciprocal(denom, approx=True)       # EUP; ~2^-12 rel err
    out_ref[...] = probs.astype(out_ref.dtype).reshape(BB, L, CLS_PAD)


def _prepare_params(w1, b1, w2, b2, num_classes, compute_dtype):
    """Reshape / pad / cast the conv parameters once.  Pure function of the
    weights -- hoist out of the hot path when calling repeatedly."""
    H = w1.shape[1]
    # conv1 (out=32, in=H, k=7) -> tap-stacked (H, 7*32): W1s[c, t*32+o] = w1[o,c,t]
    w1s = jnp.transpose(w1, (1, 2, 0)).reshape(H, KSIZE * HID_CH)
    w1s = w1s.astype(compute_dtype)
    # conv2 (out=C, in=32, k=7) -> im2col (7*32, C), lane-padded to 128:
    #   W2s[t*32 + j, c] = w2[c, j, t]
    w2s = jnp.transpose(w2, (2, 1, 0)).reshape(KSIZE * HID_CH, num_classes)
    w2s = jnp.pad(w2s, ((0, 0), (0, CLS_PAD - num_classes))).astype(compute_dtype)
    b1k = b1.reshape(1, HID_CH).astype(jnp.float32)
    b2k = jnp.full((1, CLS_PAD), NEG_INF, jnp.float32)
    b2k = b2k.at[0, :num_classes].set(b2.astype(jnp.float32))
    return w1s, b1k, w2s, b2k


def _pick_batch_block(B, L):
    """Pack several batch elements per grid step when L is small (amortises
    per-step overhead, bigger DMAs / MXU ops), while keeping >= 2 grid steps
    so both megacore TensorCores get work."""
    if L % 8 != 0:   # keep the in-kernel (BB, L, ...) reshapes layout-trivial
        return 1
    bb = max(1, min(B, 8, 512 // max(L, 1), max(1, B // 2)))
    while B % bb:
        bb -= 1
    return bb


def pssm_head_forward(x, w1, b1, w2, b2, num_classes, *,
                      compute_dtype=jnp.bfloat16,
                      out_dtype=jnp.float32,
                      return_padded=False,
                      batch_block=None):
    """x: (B, L, hidden); w1: (32, hidden, 7); w2: (num_classes, 32, 7).

    Returns (B, L, num_classes) softmax probabilities in `out_dtype`, or the
    lane-dense (B, L, 128) slab when `return_padded=True` (skips the
    wrapper-side slice copy; padded classes are exactly 0).
    """
    B, L, H = x.shape
    assert 0 < num_classes <= CLS_PAD

    w1s, b1k, w2s, b2k = _prepare_params(w1, b1, w2, b2, num_classes,
                                         compute_dtype)
    xc = x.astype(compute_dtype)   # bf16 operands: half the HBM->VMEM traffic
    # TODO(synk): on v7x, fp8 conv1 operands (x, w1s) with f32 accumulation cut
    # traffic further; validate accuracy at real hidden_size first.

    bb = batch_block or _pick_batch_block(B, L)
    assert B % bb == 0
    grid = (B // bb,)

    cbytes = jnp.dtype(compute_dtype).itemsize
    obytes = jnp.dtype(out_dtype).itemsize
    n_rows = bb * L
    # Scoped-VMEM budget: double-buffered x/out blocks, weights, and the f32
    # temporaries (y, hwin, logits).  v5e's scoped default is only 16 MiB, so
    # make the limit explicit; keep it under v7x's 64 MiB physical VMEM.
    # TODO(synk): for very long sequences add an L-tile grid axis with a 3-row
    # halo instead of growing the limit (v7x has only 64 MiB physical VMEM).
    est = (2 * n_rows * H * cbytes                         # x block (2 bufs)
           + 2 * n_rows * CLS_PAD * obytes                  # out block (2 bufs)
           + 2 * (w1s.size + w2s.size) * cbytes             # weights (2 bufs)
           + 2 * (b1k.size + b2k.size) * 4
           + n_rows * KSIZE * HID_CH * (4 + cbytes)         # y (f32) + hwin
           + 4 * n_rows * (HID_CH + CLS_PAD) * 4)           # taps/logits/slack
    vmem_limit = int(min(64 * 2**20, max(32 * 2**20, 2 * est)))
    # TODO(synk): weights/biases have constant index maps; single-buffering
    # them (pipeline_mode=pl.Buffered(1)) would save ~1 MiB more VMEM.

    cost = pl.CostEstimate(
        flops=2 * B * L * H * KSIZE * HID_CH
              + 2 * B * L * KSIZE * HID_CH * CLS_PAD,
        transcendentals=B * L * CLS_PAD,
        bytes_accessed=(x.size * cbytes + (w1s.size + w2s.size) * cbytes
                        + (b1k.size + b2k.size) * 4 + B * L * CLS_PAD * obytes))

    grid_spec = pltpu.PrefetchScalarGridSpec(
        num_scalar_prefetch=0,
        grid=grid,
        in_specs=[
            pl.BlockSpec((bb, L, H), lambda b: (b, 0, 0)),
            pl.BlockSpec((H, KSIZE * HID_CH), lambda b: (0, 0)),
            pl.BlockSpec((1, HID_CH), lambda b: (0, 0)),
            pl.BlockSpec((KSIZE * HID_CH, CLS_PAD), lambda b: (0, 0)),
            pl.BlockSpec((1, CLS_PAD), lambda b: (0, 0)),
        ],
        out_specs=pl.BlockSpec((bb, L, CLS_PAD), lambda b: (b, 0, 0)),
    )

    out_padded = pl.pallas_call(
        _pssm_kernel,
        out_shape=jax.ShapeDtypeStruct((B, L, CLS_PAD), out_dtype),
        grid_spec=grid_spec,
        compiler_params=pltpu.CompilerParams(
            dimension_semantics=("parallel",),
            vmem_limit_bytes=vmem_limit),
        cost_estimate=cost,
    )(xc, w1s, b1k, w2s, b2k)

    if return_padded:
        return out_padded
    return out_padded[:, :, :num_classes]


def _reference(x, w1, b1, w2, b2):
    """Pure-JAX reference mirroring the PyTorch module (eval mode)."""
    xt = jnp.transpose(x, (0, 2, 1))  # (B, H, L)
    y = jax.lax.conv_general_dilated(
        xt, w1, window_strides=(1,), padding=((PAD, PAD),),
        dimension_numbers=("NCH", "OIH", "NCH"))
    y = y + b1[None, :, None]
    y = jnp.maximum(y, 0.0)
    y = jax.lax.conv_general_dilated(
        y, w2, window_strides=(1,), padding=((PAD, PAD),),
        dimension_numbers=("NCH", "OIH", "NCH"))
    y = y + b2[None, :, None]
    y = jnp.transpose(y, (0, 2, 1))  # (B, L, C)
    return jax.nn.softmax(y, axis=2)


if __name__ == "__main__":
    HIDDEN, NUM_CLASSES = 32, 20

    key = jax.random.PRNGKey(0)
    kx, k1, k2, k3, k4, kx2 = jax.random.split(key, 6)

    # PyTorch Conv1d weight layout: (out, in, k).
    w1 = 0.05 * jax.random.normal(k1, (HID_CH, HIDDEN, KSIZE), dtype=jnp.float32)
    b1 = 0.01 * jax.random.normal(k2, (HID_CH,), dtype=jnp.float32)
    w2 = 0.05 * jax.random.normal(k3, (NUM_CLASSES, HID_CH, KSIZE), dtype=jnp.float32)
    b2 = 0.01 * jax.random.normal(k4, (NUM_CLASSES,), dtype=jnp.float32)

    # --- Config A: B=2, L=8 (one batch element per grid step). -------------
    xA = jax.random.normal(kx, (2, 8, HIDDEN), dtype=jnp.float32)
    refA = _reference(xA, w1, b1, w2, b2)

    outA32 = jax.block_until_ready(
        pssm_head_forward(xA, w1, b1, w2, b2, NUM_CLASSES,
                          compute_dtype=jnp.float32))
    assert outA32.shape == (2, 8, NUM_CLASSES)
    assert jnp.allclose(outA32, refA, atol=1e-3, rtol=1e-3), "A/f32 mismatch"

    outAbf = jax.block_until_ready(
        pssm_head_forward(xA, w1, b1, w2, b2, NUM_CLASSES))  # bf16 default
    assert outAbf.shape == (2, 8, NUM_CLASSES)
    assert jnp.allclose(outAbf, refA, atol=1e-2, rtol=1e-2), "A/bf16 mismatch"

    # --- Config B: B=8, L=8 (4 batch elements packed per grid step). -------
    xB = jax.random.normal(kx2, (8, 8, HIDDEN), dtype=jnp.float32)
    refB = _reference(xB, w1, b1, w2, b2)

    outB32 = jax.block_until_ready(
        pssm_head_forward(xB, w1, b1, w2, b2, NUM_CLASSES,
                          compute_dtype=jnp.float32))
    assert outB32.shape == (8, 8, NUM_CLASSES)
    assert jnp.allclose(outB32, refB, atol=1e-3, rtol=1e-3), "B/f32 mismatch"

    # Lane-dense bf16 slab output (no f32 writeback, no wrapper slice copy).
    slabB = jax.block_until_ready(
        pssm_head_forward(xB, w1, b1, w2, b2, NUM_CLASSES,
                          out_dtype=jnp.bfloat16, return_padded=True))
    assert slabB.shape == (8, 8, CLS_PAD)
    assert jnp.allclose(slabB[:, :, :NUM_CLASSES].astype(jnp.float32), refB,
                        atol=2e-2, rtol=2e-2), "B/bf16-slab mismatch"
    assert float(jnp.max(jnp.abs(slabB[:, :, NUM_CLASSES:]))) <= 1e-6

    print("KERNEL_OK")
</pallas_src>

<mosaic_0001>
module attributes {stable_mosaic.version = 11 : i64} {
  func.func @_pssm_kernel(%arg0: i32, %arg1: memref<1x8x32xf32, #tpu.memory_space<vmem>>, %arg2: memref<32x224xf32, #tpu.memory_space<vmem>>, %arg3: memref<1x32xf32, #tpu.memory_space<vmem>>, %arg4: memref<224x128xf32, #tpu.memory_space<vmem>>, %arg5: memref<1x128xf32, #tpu.memory_space<vmem>>, %arg6: memref<1x8x128xf32, #tpu.memory_space<vmem>>) attributes {dimension_semantics = [#tpu.dimension_semantics<parallel>], iteration_bounds = array<i64: 2>, scalar_prefetch = 0 : i64, scratch_operands = 0 : i64, tpu.core_type = #tpu.core_type<tc>, window_params = [{transform_indices = @transform_0, window_bounds = array<i64: 1, 8, 32>}, {pipeline_mode = #tpu.pipeline_mode<synchronous>, transform_indices = @transform_1, window_bounds = array<i64: 32, 224>}, {pipeline_mode = #tpu.pipeline_mode<synchronous>, transform_indices = @transform_2, window_bounds = array<i64: 1, 32>}, {pipeline_mode = #tpu.pipeline_mode<synchronous>, transform_indices = @transform_3, window_bounds = array<i64: 224, 128>}, {pipeline_mode = #tpu.pipeline_mode<synchronous>, transform_indices = @transform_4, window_bounds = array<i64: 1, 128>}, {transform_indices = @transform_5, window_bounds = array<i64: 1, 8, 128>}]} {
    %0 = tpu.iota {dimensions = array<i32: 1>} : vector<1x8x32xi32>
    %1 = vector.shape_cast %0 : vector<1x8x32xi32> to vector<8x32xi32>
    %c0 = arith.constant 0 : index
    %c0_0 = arith.constant 0 : index
    %c0_1 = arith.constant 0 : index
    %2 = vector.load %arg1[%c0, %c0_0, %c0_1] : memref<1x8x32xf32, #tpu.memory_space<vmem>>, vector<1x8x32xf32>
    %3 = vector.shape_cast %2 : vector<1x8x32xf32> to vector<8x32xf32>
    %c0_2 = arith.constant 0 : index
    %c0_3 = arith.constant 0 : index
    %4 = vector.load %arg2[%c0_2, %c0_3] : memref<32x224xf32, #tpu.memory_space<vmem>>, vector<32x224xf32>
    %cst = arith.constant dense<0.000000e+00> : vector<8x224xf32>
    %5 = tpu.matmul %3, %4, %cst {dimension_numbers = #tpu.dot_dimension_numbers<[1], [0], [0], [1], [0, 0, 1, 1], [], []>} : vector<8x32xf32>, vector<32x224xf32>, vector<8x224xf32> -> vector<8x224xf32>
    %6 = vector.extract_strided_slice %5 {offsets = [0, 96], sizes = [8, 32], strides = [1, 1]} : vector<8x224xf32> to vector<8x32xf32>
    %7 = vector.extract_strided_slice %5 {offsets = [0, 0], sizes = [8, 32], strides = [1, 1]} : vector<8x224xf32> to vector<8x32xf32>
    %c3_i32 = arith.constant 3 : i32
    %8 = tpu.dynamic_rotate %7 by %c3_i32 dim 0 : vector<8x32xf32>, i32 -> vector<8x32xf32>
    %c3_i32_4 = arith.constant 3 : i32
    %9 = vector.broadcast %c3_i32_4 : i32 to vector<8x32xi32>
    %10 = arith.cmpi sge, %1, %9 : vector<8x32xi32>
    %cst_5 = arith.constant 0.000000e+00 : f32
    %11 = vector.broadcast %cst_5 : f32 to vector<8x32xf32>
    %12 = arith.select %10, %8, %11 : vector<8x32xi1>, vector<8x32xf32>
    %13 = arith.addf %6, %12 : vector<8x32xf32>
    %14 = vector.extract_strided_slice %5 {offsets = [0, 32], sizes = [8, 32], strides = [1, 1]} : vector<8x224xf32> to vector<8x32xf32>
    %c2_i32 = arith.constant 2 : i32
    %15 = tpu.dynamic_rotate %14 by %c2_i32 dim 0 : vector<8x32xf32>, i32 -> vector<8x32xf32>
    %c2_i32_6 = arith.constant 2 : i32
    %16 = vector.broadcast %c2_i32_6 : i32 to vector<8x32xi32>
    %17 = arith.cmpi sge, %1, %16 : vector<8x32xi32>
    %cst_7 = arith.constant 0.000000e+00 : f32
    %18 = vector.broadcast %cst_7 : f32 to vector<8x32xf32>
    %19 = arith.select %17, %15, %18 : vector<8x32xi1>, vector<8x32xf32>
    %20 = arith.addf %13, %19 : vector<8x32xf32>
    %21 = vector.extract_strided_slice %5 {offsets = [0, 64], sizes = [8, 32], strides = [1, 1]} : vector<8x224xf32> to vector<8x32xf32>
    %c1_i32 = arith.constant 1 : i32
    %22 = tpu.dynamic_rotate %21 by %c1_i32 dim 0 : vector<8x32xf32>, i32 -> vector<8x32xf32>
    %c1_i32_8 = arith.constant 1 : i32
    %23 = vector.broadcast %c1_i32_8 : i32 to vector<8x32xi32>
    %24 = arith.cmpi sge, %1, %23 : vector<8x32xi32>
    %cst_9 = arith.constant 0.000000e+00 : f32
    %25 = vector.broadcast %cst_9 : f32 to vector<8x32xf32>
    %26 = arith.select %24, %22, %25 : vector<8x32xi1>, vector<8x32xf32>
    %27 = arith.addf %20, %26 : vector<8x32xf32>
    %28 = vector.extract_strided_slice %5 {offsets = [0, 128], sizes = [8, 32], strides = [1, 1]} : vector<8x224xf32> to vector<8x32xf32>
    %c7_i32 = arith.constant 7 : i32
    %29 = tpu.dynamic_rotate %28 by %c7_i32 dim 0 : vector<8x32xf32>, i32 -> vector<8x32xf32>
    %c7_i32_10 = arith.constant 7 : i32
    %30 = vector.broadcast %c7_i32_10 : i32 to vector<8x32xi32>
    %31 = arith.cmpi slt, %1, %30 : vector<8x32xi32>
    %cst_11 = arith.constant 0.000000e+00 : f32
    %32 = vector.broadcast %cst_11 : f32 to vector<8x32xf32>
    %33 = arith.select %31, %29, %32 : vector<8x32xi1>, vector<8x32xf32>
    %34 = arith.addf %27, %33 : vector<8x32xf32>
    %35 = vector.extract_strided_slice %5 {offsets = [0, 160], sizes = [8, 32], strides = [1, 1]} : vector<8x224xf32> to vector<8x32xf32>
    %c6_i32 = arith.constant 6 : i32
    %36 = tpu.dynamic_rotate %35 by %c6_i32 dim 0 : vector<8x32xf32>, i32 -> vector<8x32xf32>
    %c6_i32_12 = arith.constant 6 : i32
    %37 = vector.broadcast %c6_i32_12 : i32 to vector<8x32xi32>
    %38 = arith.cmpi slt, %1, %37 : vector<8x32xi32>
    %cst_13 = arith.constant 0.000000e+00 : f32
    %39 = vector.broadcast %cst_13 : f32 to vector<8x32xf32>
    %40 = arith.select %38, %36, %39 : vector<8x32xi1>, vector<8x32xf32>
    %41 = arith.addf %34, %40 : vector<8x32xf32>
    %42 = vector.extract_strided_slice %5 {offsets = [0, 192], sizes = [8, 32], strides = [1, 1]} : vector<8x224xf32> to vector<8x32xf32>
    %c5_i32 = arith.constant 5 : i32
    %43 = tpu.dynamic_rotate %42 by %c5_i32 dim 0 : vector<8x32xf32>, i32 -> vector<8x32xf32>
    %c5_i32_14 = arith.constant 5 : i32
    %44 = vector.broadcast %c5_i32_14 : i32 to vector<8x32xi32>
    %45 = arith.cmpi slt, %1, %44 : vector<8x32xi32>
    %cst_15 = arith.constant 0.000000e+00 : f32
    %46 = vector.broadcast %cst_15 : f32 to vector<8x32xf32>
    %47 = arith.select %45, %43, %46 : vector<8x32xi1>, vector<8x32xf32>
    %48 = arith.addf %41, %47 : vector<8x32xf32>
    %c0_16 = arith.constant 0 : index
    %c0_17 = arith.constant 0 : index
    %49 = vector.load %arg3[%c0_16, %c0_17] : memref<1x32xf32, #tpu.memory_space<vmem>>, vector<1x32xf32>
    %50 = vector.broadcast %49 : vector<1x32xf32> to vector<8x32xf32>
    %51 = arith.addf %48, %50 : vector<8x32xf32>
    %cst_18 = arith.constant 0.000000e+00 : f32
    %52 = vector.broadcast %cst_18 : f32 to vector<8x32xf32>
    %53 = arith.maximumf %51, %52 : vector<8x32xf32>
    %c3_i32_19 = arith.constant 3 : i32
    %54 = tpu.dynamic_rotate %53 by %c3_i32_19 dim 0 : vector<8x32xf32>, i32 -> vector<8x32xf32>
    %c3_i32_20 = arith.constant 3 : i32
    %55 = vector.broadcast %c3_i32_20 : i32 to vector<8x32xi32>
    %56 = arith.cmpi sge, %1, %55 : vector<8x32xi32>
    %cst_21 = arith.constant 0.000000e+00 : f32
    %57 = vector.broadcast %cst_21 : f32 to vector<8x32xf32>
    %58 = arith.select %56, %54, %57 : vector<8x32xi1>, vector<8x32xf32>
    %c2_i32_22 = arith.constant 2 : i32
    %59 = tpu.dynamic_rotate %53 by %c2_i32_22 dim 0 : vector<8x32xf32>, i32 -> vector<8x32xf32>
    %c2_i32_23 = arith.constant 2 : i32
    %60 = vector.broadcast %c2_i32_23 : i32 to vector<8x32xi32>
    %61 = arith.cmpi sge, %1, %60 : vector<8x32xi32>
    %cst_24 = arith.constant 0.000000e+00 : f32
    %62 = vector.broadcast %cst_24 : f32 to vector<8x32xf32>
    %63 = arith.select %61, %59, %62 : vector<8x32xi1>, vector<8x32xf32>
    %c1_i32_25 = arith.constant 1 : i32
    %64 = tpu.dynamic_rotate %53 by %c1_i32_25 dim 0 : vector<8x32xf32>, i32 -> vector<8x32xf32>
    %c1_i32_26 = arith.constant 1 : i32
    %65 = vector.broadcast %c1_i32_26 : i32 to vector<8x32xi32>
    %66 = arith.cmpi sge, %1, %65 : vector<8x32xi32>
    %cst_27 = arith.constant 0.000000e+00 : f32
    %67 = vector.broadcast %cst_27 : f32 to vector<8x32xf32>
    %68 = arith.select %66, %64, %67 : vector<8x32xi1>, vector<8x32xf32>
    %c7_i32_28 = arith.constant 7 : i32
    %69 = tpu.dynamic_rotate %53 by %c7_i32_28 dim 0 : vector<8x32xf32>, i32 -> vector<8x32xf32>
    %c7_i32_29 = arith.constant 7 : i32
    %70 = vector.broadcast %c7_i32_29 : i32 to vector<8x32xi32>
    %71 = arith.cmpi slt, %1, %70 : vector<8x32xi32>
    %cst_30 = arith.constant 0.000000e+00 : f32
    %72 = vector.broadcast %cst_30 : f32 to vector<8x32xf32>
    %73 = arith.select %71, %69, %72 : vector<8x32xi1>, vector<8x32xf32>
    %c6_i32_31 = arith.constant 6 : i32
    %74 = tpu.dynamic_rotate %53 by %c6_i32_31 dim 0 : vector<8x32xf32>, i32 -> vector<8x32xf32>
    %c6_i32_32 = arith.constant 6 : i32
    %75 = vector.broadcast %c6_i32_32 : i32 to vector<8x32xi32>
    %76 = arith.cmpi slt, %1, %75 : vector<8x32xi32>
    %cst_33 = arith.constant 0.000000e+00 : f32
    %77 = vector.broadcast %cst_33 : f32 to vector<8x32xf32>
    %78 = arith.select %76, %74, %77 : vector<8x32xi1>, vector<8x32xf32>
    %c5_i32_34 = arith.constant 5 : i32
    %79 = tpu.dynamic_rotate %53 by %c5_i32_34 dim 0 : vector<8x32xf32>, i32 -> vector<8x32xf32>
    %c5_i32_35 = arith.constant 5 : i32
    %80 = vector.broadcast %c5_i32_35 : i32 to vector<8x32xi32>
    %81 = arith.cmpi slt, %1, %80 : vector<8x32xi32>
    %cst_36 = arith.constant 0.000000e+00 : f32
    %82 = vector.broadcast %cst_36 : f32 to vector<8x32xf32>
    %83 = arith.select %81, %79, %82 : vector<8x32xi1>, vector<8x32xf32>
    %84 = tpu.concatenate %58, %63, %68, %53, %73, %78, %83 in 1 : vector<8x32xf32>, vector<8x32xf32>, vector<8x32xf32>, vector<8x32xf32>, vector<8x32xf32>, vector<8x32xf32>, vector<8x32xf32> -> vector<8x224xf32>
    %c0_37 = arith.constant 0 : index
    %c0_38 = arith.constant 0 : index
    %85 = vector.load %arg4[%c0_37, %c0_38] : memref<224x128xf32, #tpu.memory_space<vmem>>, vector<224x128xf32>
    %cst_39 = arith.constant dense<0.000000e+00> : vector<8x128xf32>
    %86 = tpu.matmul %84, %85, %cst_39 {dimension_numbers = #tpu.dot_dimension_numbers<[1], [0], [0], [1], [0, 0, 1, 1], [], []>} : vector<8x224xf32>, vector<224x128xf32>, vector<8x128xf32> -> vector<8x128xf32>
    %c0_40 = arith.constant 0 : index
    %c0_41 = arith.constant 0 : index
    %87 = vector.load %arg5[%c0_40, %c0_41] : memref<1x128xf32, #tpu.memory_space<vmem>>, vector<1x128xf32>
    %88 = vector.broadcast %87 : vector<1x128xf32> to vector<8x128xf32>
    %89 = arith.addf %86, %88 : vector<8x128xf32>
    %cst_42 = arith.constant dense<0xFF800000> : vector<8xf32>
    %90 = vector.multi_reduction <maximumf>, %89, %cst_42 [1] : vector<8x128xf32> to vector<8xf32>
    %91 = vector.shape_cast %90 : vector<8xf32> to vector<8x1xf32>
    %92 = vector.broadcast %91 : vector<8x1xf32> to vector<8x128xf32>
    %93 = arith.subf %89, %92 : vector<8x128xf32>
    %94 = math.exp %93 : vector<8x128xf32>
    %cst_43 = arith.constant dense<0.000000e+00> : vector<8xf32>
    %95 = vector.multi_reduction <add>, %94, %cst_43 [1] : vector<8x128xf32> to vector<8xf32>
    %96 = vector.shape_cast %95 : vector<8xf32> to vector<8x1xf32>
    %97 = tpu.reciprocal %96 {approx = true} : vector<8x1xf32> -> vector<8x1xf32>
    %98 = vector.broadcast %97 : vector<8x1xf32> to vector<8x128xf32>
    %99 = arith.mulf %94, %98 : vector<8x128xf32>
    %100 = vector.shape_cast %99 : vector<8x128xf32> to vector<1x8x128xf32>
    %c0_44 = arith.constant 0 : index
    %c0_45 = arith.constant 0 : index
    %c0_46 = arith.constant 0 : index
    %101 = vector.load %arg6[%c0_44, %c0_45, %c0_46] : memref<1x8x128xf32, #tpu.memory_space<vmem>>, vector<1x8x128xf32>
    tpu.vector_store %arg6[%c0_44, %c0_45, %c0_46], %100 {strides = array<i32>} : memref<1x8x128xf32, #tpu.memory_space<vmem>>, vector<1x8x128xf32>,
    return
  }
  func.func @transform_0(%arg0: i32) -> (i32, i32, i32) {
    %c0_i32 = arith.constant 0 : i32
    %c0_i32_0 = arith.constant 0 : i32
    %c0_i32_1 = arith.constant 0 : i32
    return %arg0, %c0_i32, %c0_i32_0 : i32, i32, i32
  }
  func.func @transform_1(%arg0: i32) -> (i32, i32) {
    %c0_i32 = arith.constant 0 : i32
    %c0_i32_0 = arith.constant 0 : i32
    %c0_i32_1 = arith.constant 0 : i32
    return %c0_i32, %c0_i32_0 : i32, i32
  }
  func.func @transform_2(%arg0: i32) -> (i32, i32) {
    %c0_i32 = arith.constant 0 : i32
    %c0_i32_0 = arith.constant 0 : i32
    %c0_i32_1 = arith.constant 0 : i32
    return %c0_i32, %c0_i32_0 : i32, i32
  }
  func.func @transform_3(%arg0: i32) -> (i32, i32) {
    %c0_i32 = arith.constant 0 : i32
    %c0_i32_0 = arith.constant 0 : i32
    %c0_i32_1 = arith.constant 0 : i32
    return %c0_i32, %c0_i32_0 : i32, i32
  }
  func.func @transform_4(%arg0: i32) -> (i32, i32) {
    %c0_i32 = arith.constant 0 : i32
    %c0_i32_0 = arith.constant 0 : i32
    %c0_i32_1 = arith.constant 0 : i32
    return %c0_i32, %c0_i32_0 : i32, i32
  }
  func.func @transform_5(%arg0: i32) -> (i32, i32, i32) {
    %c0_i32 = arith.constant 0 : i32
    %c0_i32_0 = arith.constant 0 : i32
    %c0_i32_1 = arith.constant 0 : i32
    return %arg0, %c0_i32, %c0_i32_0 : i32, i32, i32
  }
}

</mosaic_0001>

<bundles_post_ra>
// kernel: tpu_custom_call.1
= control target key start
LH: loop header
LB: loop body
LE: loop exit
PB: predicated region body
PF: predicated region fallthrough
CT: control target
= control target key end

     0   :  { %10 = vsyncpa [#allocation3], 0  ;;  %s1350_s0 = inlined_call_operand.hbm [shape: f32[2,8,32], index: 0, kind: input, shape index: {}]   ;;  %s1351_s1 = inlined_call_operand.hbm [shape: f32[32,224], index: 1, kind: input, shape index: {}]   ;;  %s1352_s2 = inlined_call_operand.vmem [shape: f32[1,32], index: 2, kind: input, shape index: {}]   ;;  %s1353_s3 = inlined_call_operand.hbm [shape: f32[224,128], index: 3, kind: input, shape index: {}]   ;;  %s1354_s4 = inlined_call_operand.vmem [shape: f32[1,128], index: 4, kind: input, shape index: {}]   ;;  %s1355_s5 = inlined_call_operand.hbm [shape: f32[2,8,128], index: 5, kind: output, shape index: {}]  }
   0x1   :  { %12 = vsyncpa [#allocation3 + $0x1], 0 }
   0x2   :  { %13 = vsyncpa [#allocation6], 0 }
   0x3   :  { %14 = vsyncpa [#allocation4], 0 }
   0x4   :  { %16 = vsyncpa [#allocation4 + $0x1], 0  ;;  %s1039_s18 = smov 0   ;;  %s1041_s19 = smov 0  }
   0x5   :  { %s1043_s20 = smov 0   ;;  %s1045_s21 = smov 0  }
   0x6 LB: > { %s1060_s22 = sadd.s32 4294967295, %s994_s21   ;;  %s688_s23 = sadd.s32 4294967294, %s994_s21   ;;  %s994_s21 = sphi %s1045_s21, %s1375_s21   ;;  %s990_s20 = sphi %s1043_s20, %s1374_s20   ;;  %s986_s19 = sphi %s1041_s19, %s1373_s19   ;;  %s982_s18 = sphi %s1039_s18, %s1372_s18  }
   0x7   : > { %p42_p0 = scmp.ne.s32.totalorder %s986_s19, %s982_s18  ;;  %p1356_p1 = scmp.eq.s32.totalorder %s1060_s22, 0 }
   0x8   : > { %p156_p3 = scmp.eq.s32.totalorder %s688_s23, 1  ;;  %p689_p5 = scmp.ge.s32.totalorder %s994_s21, 1 }
   0x9   : > { %p1069_p4 = por %p1356_p1, %p42_p0  ;;  %p163_p7 = scmp.lt.s32.totalorder %s994_s21, 3 }
   0xa   : > { %p1074_p6 = por %p156_p3, %p42_p0  ;;  %s996_s27 = smov [#allocation5]  }
   0xb   : > { %s1359_s24 = scalar_select %p1069_p4, 1, 0 }
   0xc   : > { %s1360_s25 = scalar_select %p1074_p6, 1, 0 }
   0xd   : > { %p1079_p8 = pnand %p689_p5, %p163_p7  ;;  %s175_s28 = sshll.u32 %s996_s27, 4  ;;  %s1083_s28 = int_to_ptr.vmem [resolvable:$true] %s175_s28 }
   0xe   : > { %s997_s30 = smov [#allocation7]   ;;  %s838_s9 = scalar_lea.hbm %s1351_s1, 1024 }
   0xf   : > { %p770_p9 = pneg %p1079_p8  ;;  %s191_s6 = sshll.u32 %s997_s30, 4  ;;  %s1094_s6 = int_to_ptr.vmem [resolvable:$true] %s191_s6 }
  0x10   : > { %p839_p12 = scmp.ne.s32.totalorder %s1351_s1, %s838_s9  ;;  %p845_p5 = scmp.lt.u32.totalorder %s838_s9, %s1351_s1 }
  0x11   : > { %p1090_p11 = pnand %p770_p9, %p1356_p1 }
  0x13   : > { %p840_p13 = pneg %p1090_p11 }
  0x15   : > { %p841_p0 = pnand %p840_p13, %p839_p12 }
  0x17   : > { %p842_p3 = pneg %p841_p0 }
  0x19   : > { %p847_p7 = pnand %p845_p5, %p842_p3 }
  0x1b   : > { %850 = shalt.err (!%p847_p7)
}
  0x1c   : > { %s851_s14 = scalar_lea.vmem %s1083_s28, 1024  ;;  %p859_p2 = scmp.lt.s32.totalorder %s1083_s28, %s1083_s28 }
  0x1d   : > { %p852_p9 = scmp.ne.s32.totalorder %s1083_s28, %s851_s14  ;;  %p860_p12 = scmp.lt.s32.totalorder %s851_s14, %s851_s14 }
  0x1f   : > { %p854_p10 = pnand %p852_p9, %p840_p13  ;;  %p861_p0 = por %p860_p12, %p859_p2 }
  0x21   : > { %p855_p1 = pneg %p854_p10 }
  0x23   : > { %p862_p6 = pnand %p861_p0, %p855_p1 }
  0x25   : > { %865 = shalt.err (!%p862_p6)
}
  0x26   : > { %s998_s15 = smov 256   ;;  %s999_s16 = smov 16  }
  0x27   : > { %773 = dma.hbm_to_vmem [thread:$0]  (!%p1090_p11), %s1351_s1, 1024, %s1083_s28, [#allocation6], %s998_s15, %s998_s15, %s999_s16  }
  0x28   : > { %s866_s7 = scalar_lea.hbm %s1353_s3, 3584 }
  0x29   : > { %p867_p2 = scmp.ne.s32.totalorder %s1353_s3, %s866_s7  ;;  %p873_p10 = scmp.lt.u32.totalorder %s866_s7, %s1353_s3 }
  0x2b   : > { %p869_p1 = pnand %p867_p2, %p840_p13 }
  0x2d   : > { %p870_p6 = pneg %p869_p1 }
  0x2f   : > { %p875_p3 = pnand %p873_p10, %p870_p6 }
  0x31   : > { %878 = shalt.err (!%p875_p3)
}
  0x32   : > { %s879_s28 = scalar_lea.vmem %s1094_s6, 3584  ;;  %p887_p12 = scmp.lt.s32.totalorder %s1094_s6, %s1094_s6 }
  0x33   : > { %p880_p5 = scmp.ne.s32.totalorder %s1094_s6, %s879_s28  ;;  %p888_p0 = scmp.lt.s32.totalorder %s879_s28, %s879_s28 }
  0x35   : > { %p882_p7 = pnand %p880_p5, %p840_p13  ;;  %p889_p2 = por %p888_p0, %p887_p12 }
  0x37   : > { %p883_p9 = pneg %p882_p7 }
  0x39   : > { %p890_p1 = pnand %p889_p2, %p883_p9 }
  0x3b   : > { %893 = shalt.err (!%p890_p1)
}
  0x3c   : > { %s1000_s12 = smov 128   ;;  %s1001_s13 = smov 8  }
  0x3d   : > { %776 = dma.hbm_to_vmem [thread:$0]  (!%p1090_p11), %s1353_s3, 3584, %s1094_s6, [#allocation6], %s1000_s12, %s1000_s12, %s1001_s13  }
  0x3e   : > { %s1149_s16 = sadd.s32 1, %s994_s21   ;;  %s29_s23 = sadd.s32 1, %s990_s20 }
  0x3f   : > { %s26_s17 = ssub.s32 %s994_s21, %s1149_s16  ;;  %p36_p6 = scmp.ne.s32.totalorder %s990_s20, %s986_s19 }
  0x40   : > { %p27_p13 = scmp.eq.s32.totalorder %s26_s17, 0  ;;  %p37_p10 = scmp.eq.s32.totalorder %s994_s21, 0 }
  0x41   : > { %p1363_p5 = scmp.eq.s32.totalorder %s1060_s22, 1  ;;  %p787_p9 = scmp.lt.s32.totalorder %s994_s21, 2 }
  0x42   : > { %s1158_s27 = scalar_select %p27_p13, %s990_s20, %s29_s23  }
  0x43   : > { %p38_p3 = por %p37_p10, %p36_p6  ;;  %p1162_p7 = por %p1363_p5, %p36_p6 }
  0x44   : > { %s208_s29 = sand.u32 1, %s990_s20   ;;  %s694_s6 = sshll.u32 %s994_s21, 7 }
  0x45   : > { %s1364_s30 = scalar_select %p1162_p7, 1, 0 }
  0x46   : > { %s693_s7 = sshll.u32 %s208_s29, 3  ;;  %s1172_s10 = scalar_lea.hbm %s1350_s0, %s694_s6 }
  0x47   : > { %s212_s11 = scalar_lea.vmem [#allocation2], %s693_s7  ;;  %p1176_p11 = pnand %p787_p9, %p38_p3 }
  0x48   : > { %s219_s28 = sshll.u32 %s212_s11, 4  ;;  %s209_s13 = scalar_lea.sflag [#allocation3], %s208_s29  ;;  %s1174_s28 = int_to_ptr.vmem [resolvable:$true] %s219_s28 }
  0x49   : > { %s894_s14 = scalar_lea.hbm %s1172_s10, 128  ;;  %p896_p0 = pneg %p1176_p11 }
  0x4a   : > { %p895_p12 = scmp.ne.s32.totalorder %s1172_s10, %s894_s14  ;;  %s899_s23 = scalar_lea.hbm %s1350_s0, 256 }
  0x4b   : > { %p900_p13 = scmp.lt.u32.totalorder %s1172_s10, %s1350_s0  ;;  %p901_p6 = scmp.lt.u32.totalorder %s899_s23, %s894_s14 }
  0x4c   : > { %p897_p2 = pnand %p896_p0, %p895_p12  ;;  %p903_p3 = scmp.lt.u32.totalorder %s894_s14, %s1172_s10 }
  0x4d   : > { %p902_p10 = por %p901_p6, %p900_p13 }
  0x4e   : > { %p898_p1 = pneg %p897_p2 }
  0x4f   : > { %p904_p5 = por %p903_p3, %p902_p10 }
  0x51   : > { %p905_p9 = pnand %p904_p5, %p898_p1 }
  0x53   : > { %908 = shalt.err (!%p905_p9)
}
  0x54   : > { %s909_s29 = scalar_lea.vmem %s1174_s28, 128  ;;  %s1002_s8 = smov [#allocation2]  }
  0x55   : > { %p910_p12 = scmp.ne.s32.totalorder %s1174_s28, %s909_s29  ;;  %s914_s9 = sshll.u32 %s1002_s8, 4  ;;  %s915_s9 = int_to_ptr.vmem [resolvable:$false] %s914_s9 }
  0x56   : > { %s916_s11 = scalar_lea.vmem %s915_s9, 256  ;;  %p917_p4 = scmp.lt.s32.totalorder %s1174_s28, %s915_s9 }
  0x57   : > { %p912_p2 = pnand %p910_p12, %p896_p0  ;;  %p918_p13 = scmp.lt.s32.totalorder %s916_s11, %s909_s29 }
  0x59   : > { %p913_p7 = pneg %p912_p2  ;;  %p919_p6 = por %p918_p13, %p917_p4 }
  0x5b   : > { %p920_p10 = pnand %p919_p6, %p913_p7 }
  0x5d   : > { %923 = shalt.err (!%p920_p10)
}
  0x5e   : > { %780 = dma.hbm_to_vmem [thread:$0]  (!%p1176_p11), %s1172_s10, 128, %s1174_s28, %s209_s13  }
  0x5f   : > { %228 = sbr.rel (%p1079_p8) target bundleno = 1357 (0x54d), region = 40  ;;  %s1208_s14 = sand.u32 (!%p1079_p8), 1, %s986_s19  }
  0x60   : > { %s696_s15 = sshll.u32 (!%p1079_p8), %s1208_s14, 3  ;;  %s231_s17 = scalar_lea.sflag (!%p1079_p8), [#allocation3], %s1208_s14 }
  0x61   : > { %s234_s23 = scalar_lea.vmem (!%p1079_p8), [#allocation2], %s696_s15  ;;  %p1366_p4 = scmp.ne.s32.totalorder (!%p1079_p8), %s1359_s24, 0 }
  0x66   : > { %969 = dma.done.wait (%p1366_p4), %s231_s17, 128  }
  0x67   : > { %971 = vsyncadd (%p1366_p4), %s231_s17, 4294967168  ;;  %p1367_p7 = scmp.eq.s32.totalorder %s1060_s22, 0 }
  0x69   : > { %973 = dma.done.wait (%p1367_p7), [#allocation6], 4608   ;;  %p1368_p8 = pmov %p1367_p7 }
  0x6a   : > { %v1003_v0 = vmov 0.0   ;;  %v273_v1 = vld [vmem:[#allocation5 + $0x8] sm:$0xff]  ;;  %v275_v2 = vld [vmem:[#allocation5 + $0x18] sm:$0xff]  ;;  %v272_v3 = vld [vmem:[#allocation5] sm:$0xff]  ;;  %vm280_vm0 = vcmask 261120   ;;  %v269_v14 = vlaneseq  ;;  %s1004_s24 = smov 96  }
  0x6b   : > { %975 = vsyncadd (%p1368_p8), [#allocation6], 4294962688  ;;  %348 = vmatprep.mubr.f32.mxu0 %v1003_v0  ;;  %v708_v4 = vpack.c.bf16 %v275_v2, %v273_v1  ;;  %v274_v5 = vld [vmem:[#allocation5 + $0x10] sm:$0xff]  ;;  %v277_v6 = vld [vmem:[#allocation5 + $0x28] sm:$0xff]  ;;  %s1005_s26 = smov 64   ;;  %v1006_v51 = vmov 0.0|0.0  }
  0x6c   : > { %v279_v7 = vld [vmem:[#allocation5 + $0x38] sm:$0xff]  ;;  %v710_v8 = vpack.c.bf16 %v274_v5, %v272_v3  ;;  %v276_v10 = vld [vmem:[#allocation5 + $0x20] sm:$0xff]  ;;  %v278_v11 = vld [vmem:[#allocation5 + $0x30] sm:$0xff]  ;;  %v1224_v17 = vshrl.u32 %v269_v14, 7  ;;  %716 = vmatprep.subr.bf16.mxu1 %v1006_v51  ;;  %s1007_s12 = smov 32   ;;  %vm461_vm7 = vcmask 523264  }
  0x6d   : > { %v712_v9 = vpack.c.bf16 %v279_v7, %v277_v6  ;;  %709 = vmatprep.subr.bf16.mxu0 %v708_v4  ;;  %v714_v12 = vpack.c.bf16 %v278_v11, %v276_v10  ;;  %v271_v13 = vld [vmem:[%s234_s23] sm:$0xff]  ;;  %v467_v47 = vld [vmem:[#allocation7] sm:$0xff]  ;;  %v468_v48 = vld [vmem:[#allocation7 + $0x8] sm:$0xff]  ;;  %vm463_vm8 = vcmask 785408   ;;  %s705_s6 = sshll.u32 %s1060_s22, 7  ;;  %s268_s29 = scalar_lea.vmem [#allocation8], %s696_s15 }
  0x6e   : > { %711 = vmatpush1.bf16.msra.mxu0 %v710_v8  ;;  %vm356_vm1 = vcmp.ge.s32.totalorder %v1224_v17, 3  ;;  %vm368_vm2 = vcmp.ge.s32.totalorder %v1224_v17, 2  ;;  %vm379_vm3 = vcmp.ge.s32.totalorder %v1224_v17, 1  ;;  %vm387_vm4 = vcmp.lt.s32.totalorder %v1224_v17, 7  ;;  %v701_v34 = vld [vmem:[%s1352_s2] ss:$0 sm:$0xff]  ;;  %s1306_s17 = scalar_lea.hbm %s1355_s5, %s705_s6 }
  0x6f   : > { %713 = vmatprep.subr.bf16.mxu0 %v712_v9  ;;  %vm399_vm5 = vcmp.lt.s32.totalorder %v1224_v17, 6  ;;  %vm410_vm6 = vcmp.lt.s32.totalorder %v1224_v17, 5  ;;  %v469_v49 = vld [vmem:[#allocation7 + $0x10] sm:$0xff]  ;;  %v717_v52 = vpack.c.bf16 %v468_v48, %v467_v47  ;;  %v470_v53 = vld [vmem:[#allocation7 + $0x18] sm:$0xff]  ;;  %v471_v57 = vld [vmem:[#allocation7 + $0x20] sm:$0xff]  ;;  %s599_s8 = sshll.u32 %s268_s29, 4  ;;  %s1308_s8 = int_to_ptr.vmem [resolvable:$true] %s599_s8 }
  0x70   : > { %v720_v55 = vpack.c.bf16 %v470_v53, %v469_v49  ;;  %v472_v58 = vld [vmem:[#allocation7 + $0x28] sm:$0xff]  ;;  %v473_v60 = vld [vmem:[#allocation7 + $0x30] sm:$0xff]  ;;  %v474_v61 = vld [vmem:[#allocation7 + $0x38] sm:$0xff]  ;;  %s586_s23 = scalar_lea.sflag [#allocation4], %s1208_s14  ;;  %p1369_p0 = scmp.ne.s32.totalorder %s1364_s30, 0 }
  0x71   : > { %718 = vmatpush1.bf16.msra.mxu1 %v717_v52  ;;  %v723_v59 = vpack.c.bf16 %v472_v58, %v471_v57  ;;  %v726_v62 = vpack.c.bf16 %v474_v61, %v473_v60  ;;  %v475_v63 = vld [vmem:[#allocation7 + $0x40] sm:$0xff]  ;;  %v476_v0 = vld [vmem:[#allocation7 + $0x48] sm:$0xff]  ;;  %v477_v2 = vld [vmem:[#allocation7 + $0x50] sm:$0xff]  ;;  %s1008_s22 = smov [#allocation8]  }
  0x72   : > { %715 = vmatpush1.bf16.msra.mxu0 %v714_v12  ;;  %719 = vmatprep.subr.bf16.mxu1 %v1006_v51  ;;  %v729_v1 = vpack.c.bf16 %v476_v0, %v475_v63  ;;  %v478_v3 = vld [vmem:[#allocation7 + $0x58] sm:$0xff]  ;;  %v479_v5 = vld [vmem:[#allocation7 + $0x60] sm:$0xff]  ;;  %v480_v6 = vld [vmem:[#allocation7 + $0x68] sm:$0xff]  ;;  %s928_s15 = sshll.u32 %s1008_s22, 4  ;;  %s929_s15 = int_to_ptr.vmem [resolvable:$false] %s928_s15 }
  0x73   : > { %v732_v4 = vpack.c.bf16 %v478_v3, %v477_v2  ;;  %v735_v7 = vpack.c.bf16 %v480_v6, %v479_v5  ;;  %v481_v8 = vld [vmem:[#allocation7 + $0x70] sm:$0xff]  ;;  %v482_v9 = vld [vmem:[#allocation7 + $0x78] sm:$0xff]  ;;  %v483_v11 = vld [vmem:[#allocation7 + $0x80] sm:$0xff]  ;;  %p931_p5 = scmp.lt.s32.totalorder %s1308_s8, %s929_s15 }
  0x74   : > { %v738_v10 = vpack.c.bf16 %v482_v9, %v481_v8  ;;  %v484_v12 = vld [vmem:[#allocation7 + $0x88] sm:$0xff]  ;;  %v485_v14 = vld [vmem:[#allocation7 + $0x90] sm:$0xff] }
  0x75   : > { %700 = vmatmul.mubr.msk.f32.vlgmr.msra.gmra.mrb[0].mxu0 %vm280_vm0, %v271_v13  ;;  %721 = vmatpush1.bf16.msra.mxu1 %v720_v55  ;;  %v741_v13 = vpack.c.bf16 %v484_v12, %v483_v11  ;;  %v702_v17 = vld [vmem:[%s1354_s4] ss:$0 sm:$0xff] }
  0x76   : > { %722 = vmatprep.subr.bf16.mxu1 %v1006_v51 }
  0x79   : > { %724 = vmatpush1.bf16.msra.mxu1 %v723_v59 }
  0x7a   : > { %725 = vmatprep.subr.bf16.mxu1 %v1006_v51 }
  0x7d   : > { %727 = vmatpush1.bf16.msra.mxu1 %v726_v62 }
  0x7e   : > { %728 = vmatprep.subr.bf16.mxu1 %v1006_v51 }
  0x81   : > { %730 = vmatpush1.bf16.msra.mxu1 %v729_v1 }
  0x82   : > { %731 = vmatprep.subr.bf16.mxu1 %v1006_v51 }
  0x85   : > { %733 = vmatpush1.bf16.msra.mxu1 %v732_v4 }
  0x86   : > { %734 = vmatprep.subr.bf16.mxu1 %v1006_v51 }
  0x89   : > { %736 = vmatpush1.bf16.msra.mxu1 %v735_v7 }
  0x8a   : > { %737 = vmatprep.subr.bf16.mxu1 %v1006_v51 }
  0x8d   : > { %739 = vmatpush1.bf16.msra.mxu1 %v738_v10 }
  0x8e   : > { %740 = vmatprep.subr.bf16.mxu1 %v1006_v51 }
  0x91   : > { %742 = vmatpush1.bf16.msra.mxu1 %v741_v13 }
  0x92   : > { %743 = vmatprep.subr.bf16.mxu1 %v1006_v51 }
 0x148   : > { %v350_v15 = vpop.f32.mrb[0].mxu0 }
 0x149   : > { %364 = vrot.lane.b32.xlu0 %v350_v15, %s1004_s24  ;;  %v352_v16 = vpop.f32.mrb[1].mxu0  ;;  %v355_v18 = vrot.slane %v350_v15, 5 }
 0x14a   : > { %395 = vrot.lane.b32.xlu1 %v352_v16, %s1004_s24  ;;  %v386_v23 = vrot.slane %v352_v16, 1 }
 0x14b   : > { %v357_v19 = vsel %vm356_vm1, %v355_v18, 0.0  ;;  %v487_v18 = vld [vmem:[#allocation7 + $0xa0] sm:$0xff] }
 0x14c   : > { %v388_v31 = vsel %vm387_vm4, %v386_v23, 0.0 }
 0x14d   : > { %375 = vrot.lane.b32.xlu0 %v350_v15, %s1005_s26 }
 0x14e   : > { %406 = vrot.lane.b32.xlu1 %v352_v16, %s1005_s26 }
 0x151   : > { %359 = vrot.lane.b32.xlu0 %v357_v19, %s1004_s24  ;;  %v488_v19 = vld [vmem:[#allocation7 + $0xa8] sm:$0xff] }
 0x1bb   : > { %v365_v20 = vpop.permute.xlu0 %364 }
 0x1bc   : > { %v367_v21 = vrot.slane %v365_v20, 6  ;;  %v396_v22 = vpop.permute.xlu1 %395  ;;  %v747_v20 = vpack.c.bf16 %v488_v19, %v487_v18 }
 0x1bd   : > { %v398_v28 = vrot.slane %v396_v22, 2  ;;  %v490_v22 = vld [vmem:[#allocation7 + $0xb8] sm:$0xff] }
 0x1be   : > { %v369_v24 = vsel %vm368_vm2, %v367_v21, 0.0  ;;  %v489_v21 = vld [vmem:[#allocation7 + $0xb0] sm:$0xff] }
 0x1bf   : > { %v376_v25 = vpop.permute.xlu0 %375  ;;  %371 = vrot.lane.b32.xlu1 %v369_v24, %s1004_s24  ;;  %v400_v32 = vsel %vm399_vm5, %v398_v28, 0.0  ;;  %v750_v23 = vpack.c.bf16 %v490_v22, %v489_v21  ;;  %v491_v24 = vld [vmem:[#allocation7 + $0xc0] sm:$0xff]  ;;  %v494_v28 = vld [vmem:[#allocation7 + $0xd8] sm:$0xff] }
 0x1c0   : > { %v378_v26 = vrot.slane %v376_v25, 7  ;;  %v407_v27 = vpop.permute.xlu1 %406  ;;  %v492_v25 = vld [vmem:[#allocation7 + $0xc8] sm:$0xff] }
 0x1c1   : > { %v409_v29 = vrot.slane %v407_v27, 3  ;;  %v493_v27 = vld [vmem:[#allocation7 + $0xd0] sm:$0xff] }
 0x1c2   : > { %v380_v30 = vsel %vm379_vm3, %v378_v26, 0.0  ;;  %v753_v26 = vpack.c.bf16 %v492_v25, %v491_v24 }
 0x1c3   : > { %382 = vrot.lane.b32.xlu0 %v380_v30, %s1004_s24  ;;  %390 = vrot.lane.b32.xlu1 %v388_v31, %s1004_s24  ;;  %v411_v33 = vsel %vm410_vm6, %v409_v29, 0.0  ;;  %v360_v35 = vpop.permute.xlu0 %359  ;;  %v756_v29 = vpack.c.bf16 %v494_v28, %v493_v27 }
 0x1c4   : > { %v362_v37 = vadd.f32 %v360_v35, %v350_v15  ;;  %v486_v15 = vld [vmem:[#allocation7 + $0x98] sm:$0xff] }
 0x1c5   : > { %v744_v16 = vpack.c.bf16 %v486_v15, %v485_v14 }
 0x1c7   : > { %402 = vrot.lane.b32.xlu0 %v400_v32, %s1004_s24  ;;  %413 = vrot.lane.b32.xlu1 %v411_v33, %s1004_s24 }
 0x1c8   : > { %745 = vmatpush1.bf16.msra.mxu1 %v744_v16 }
 0x1c9   : > { %746 = vmatprep.subr.bf16.mxu1 %v1006_v51 }
 0x1cb   : > { %423 = vrot.lane.b32.xlu0 %v701_v34, %s1004_s24  ;;  %s924_s24 = scalar_lea.vmem %s1308_s8, 128 }
 0x1cc   : > { %748 = vmatpush1.bf16.msra.mxu1 %v747_v20  ;;  %p925_p11 = scmp.ne.s32.totalorder %s1308_s8, %s924_s24 }
 0x1cd   : > { %749 = vmatprep.subr.bf16.mxu1 %v1006_v51 }
 0x1ce   : > { %p926_p1 = pnand %p925_p11, %p1369_p0 }
 0x1d0   : > { %751 = vmatpush1.bf16.msra.mxu1 %v750_v23  ;;  %p927_p3 = pneg %p926_p1 }
 0x1d1   : > { %752 = vmatprep.subr.bf16.mxu1 %v1006_v51 }
 0x1d4   : > { %754 = vmatpush1.bf16.msra.mxu1 %v753_v26 }
 0x1d5   : > { %755 = vmatprep.subr.bf16.mxu1 %v1006_v51 }
 0x1d8   : > { %757 = vmatpush1.bf16.msra.mxu1 %v756_v29 }
 0x231   : > { %v372_v36 = vpop.permute.xlu1 %371 }
 0x232   : > { %v374_v38 = vadd.f32 %v372_v36, %v362_v37 }
 0x235   : > { %v383_v39 = vpop.permute.xlu0 %382  ;;  %v391_v40 = vpop.permute.xlu1 %390 }
 0x236   : > { %v385_v41 = vadd.f32 %v383_v39, %v374_v38 }
 0x238   : > { %v393_v42 = vadd.f32 %v391_v40, %v385_v41 }
 0x239   : > { %v403_v43 = vpop.permute.xlu0 %402  ;;  %v414_v45 = vpop.permute.xlu1 %413 }
 0x23a   : > { %v405_v44 = vadd.f32 %v403_v43, %v393_v42 }
 0x23c   : > { %v416_v46 = vadd.f32 %v414_v45, %v405_v44 }
 0x23d   : > { %v424_v50 = vpop.permute.xlu0 %423 }
 0x23e   : > { %v1258_v54 = vadd.f32 %v424_v50, %v416_v46 }
 0x240   : > { %v427_v56 = vmax.f32 %v1258_v54, 0.0 }
 0x242   : > { %429 = vrot.lane.b32.xlu1 %v427_v56, %s1007_s12 }
 0x2b4   : > { %v430_v30 = vpop.permute.xlu1 %429 }
 0x2b5   : > { %v440_v31 = vrot.slane %v430_v30, 2  ;;  %v434_v32 = vrot.slane %v430_v30, 6  ;;  %v442_v35 = vrot.slane %v430_v30, 3  ;;  %v436_v36 = vrot.slane %v430_v30, 7 }
 0x2b6   : > { %v438_v39 = vrot.slane %v430_v30, 1  ;;  %v432_v40 = vrot.slane %v430_v30, 5 }
 0x2b7   : > { %v441_v33 = vsel %vm399_vm5, %v440_v31, 0.0  ;;  %v435_v34 = vsel %vm368_vm2, %v434_v32, 0.0  ;;  %v443_v37 = vsel %vm410_vm6, %v442_v35, 0.0  ;;  %v437_v38 = vsel %vm379_vm3, %v436_v36, 0.0 }
 0x2b8   : > { %453 = vrot.lane.b32.xlu1 %v441_v33, %s1007_s12  ;;  %445 = vrot.lane.b32.xlu0 %v435_v34, %s1007_s12  ;;  %v439_v43 = vsel %vm387_vm4, %v438_v39, 0.0  ;;  %v433_v44 = vsel %vm356_vm1, %v432_v40, 0.0 }
 0x2bc   : > { %457 = vrot.lane.b32.xlu1 %v443_v37, %s1005_s26  ;;  %449 = vrot.lane.b32.xlu0 %v437_v38, %s1005_s26  ;;  %s930_s26 = scalar_lea.vmem %s929_s15, 256 }
 0x2bd   : > { %p932_p9 = scmp.lt.s32.totalorder %s930_s26, %s924_s24 }
 0x2bf   : > { %p933_p12 = por %p932_p9, %p931_p5 }
 0x2c1   : > { %p934_p2 = pnand %p933_p12, %p927_p3 }
 0x32a   : > { %v454_v41 = vpop.permute.xlu1 %453  ;;  %v446_v42 = vpop.permute.xlu0 %445 }
 0x32b   : > { %v465_v45 = vsel %vm280_vm0, %v439_v43, %v454_v41  ;;  %v460_v46 = vsel %vm280_vm0, %v433_v44, %v446_v42 }
 0x32e   : > { %v458_v47 = vpop.permute.xlu1 %457  ;;  %v450_v48 = vpop.permute.xlu0 %449 }
 0x32f   : > { %v462_v49 = vsel %vm461_vm7, %v460_v46, %v450_v48  ;;  %v466_v50 = vsel %vm461_vm7, %v465_v45, %v458_v47 }
 0x330   : > { %703 = vmatprep.mubr.msk.f32.mxu1 %vm463_vm8, %v466_v50  ;;  %v464_v51 = vsel %vm463_vm8, %v462_v49, %v427_v56 }
 0x331   : > { %570 = vmatmul.mubr.f32.vlgmr.msra.gmra.mrb[0].mxu1 %v464_v51 }
 0x404   : > { %v571_v52 = vpop.f32.mrb[0].mxu1 }
 0x405   : > { %v572_v53 = vadd.f32 %v702_v17, %v571_v52  ;;  %v573_v55 = vpop.f32.mrb[1].mxu1 }
 0x407   : > { %575 = vmax.xlane.f32.xlu0 %v572_v53 }
 0x494   : > { %v576_v57 = vpop.xlane.xlu0 %575 }
 0x495   : > { %v577_v58 = vsub.f32 %v572_v53, %v576_v57 }
 0x497   : > { %v578_v59 = vmul.f32 1.442695, %v577_v58 }
 0x499   : > { %834 = vpow2.f32 %v578_v59 }
 0x4a3   : > { %v835_v60 = vpop.eup %834 }
 0x4a4   : > { %580 = vadd.xlane.f32.xlu1 %v835_v60 }
 0x531   : > { %v581_v54 = vpop.xlane.xlu1 %580 }
 0x532   : > { %836 = vrcp.f32 %v581_v54 }
 0x53c   : > { %v837_v56 = vpop.eup %836 }
 0x53d   : > { %v583_v61 = vmul.f32 %v837_v56, %v835_v60 }
 0x53f   : > { %584 = vst [vmem:[%s268_s29] sm:$0xff] %v583_v61 }
 0x540   : > { %937 = shalt.err (!%p934_p2)
}
 0x541   : > { %s938_s14 = scalar_lea.hbm %s1306_s17, 128  ;;  %s942_s12 = scalar_lea.hbm %s1355_s5, 256 }
 0x542   : > { %p939_p13 = scmp.ne.s32.totalorder %s1306_s17, %s938_s14  ;;  %p943_p4 = scmp.lt.u32.totalorder %s1306_s17, %s1355_s5 }
 0x543   : > { %p944_p7 = scmp.lt.u32.totalorder %s942_s12, %s938_s14  ;;  %p946_p11 = scmp.lt.u32.totalorder %s938_s14, %s1306_s17 }
 0x544   : > { %p940_p6 = pnand %p939_p13, %p1369_p0 }
 0x545   : > { %p945_p8 = por %p944_p7, %p943_p4 }
 0x546   : > { %p941_p10 = pneg %p940_p6 }
 0x547   : > { %p947_p1 = por %p946_p11, %p945_p8 }
 0x549   : > { %p948_p3 = pnand %p947_p1, %p941_p10 }
 0x54b   : > { %951 = shalt.err (!%p948_p3)
}
 0x54c   : > { %768 = dma.vmem_to_hbm [thread:$0]  (%p1369_p0), %s1308_s8, 128, %s1306_s17, %s586_s23  }
 0x54d PF: > { %s611_s6 = sand.u32 1, %s982_s18   ;;  %p1370_p5 = scmp.ne.s32.totalorder %s1360_s25, 0 }
 0x54e   : > { %p1371_p9 = scmp.ge.s32.totalorder %s994_s21, 2  ;;  %s612_s29 = scalar_lea.sflag [#allocation4], %s611_s6 }
 0x550   : > { %p782_p12 = pnand %p1371_p9, %p1370_p5 }
 0x552   : > { %977 = dma.done.wait (!%p782_p12), %s612_s29, 128  }
 0x553   : > { %979 = vsyncadd (!%p782_p12), %s612_s29, 4294967168  ;;  %p19_p2 = scmp.ge.s32.totalorder %s1149_s16, 4   ;;  %s1372_s18 = smov %s986_s19 }
 0x554   : > { %s1373_s19 = smov %s990_s20  ;;  %s1374_s20 = smov %s1158_s27 }
 0x555   : > { %s1375_s21 = smov %s1149_s16  ;;  %21 = sbr.rel (!%p19_p2) target bundleno = 6 (0x6), region = 93 }
 0x55c   :  { %617 = vsyncpa [#allocation3], 1 }
 0x55d   :  { %619 = vsyncpa [#allocation3 + $0x1], 1 }
 0x55e   :  { %620 = vsyncpa [#allocation6], 1 }
 0x55f   :  { %621 = vsyncpa [#allocation4], 1 }
 0x560   :  { %623 = vsyncpa [#allocation4 + $0x1], 1 }

</bundles_post_ra>
